<compile_context>
chip_gen: v7x
topology: tpu7x:2x2x1
jax: 0.10.0
libtpu: 0.0.40
codegen_flags: <defaults>
</compile_context>

<pallas_src>
from functools import partial

import jax
import jax.numpy as jnp
from jax.experimental import pallas as pl
from jax.experimental.pallas import tpu as pltpu


# --------------------------------------------------------------------------- helpers

def _round_up(x, m):
    return ((x + m - 1) // m) * m


def _vmem_budget_bytes():
    """Generation-aware (per-TensorCore) VMEM budget + compiler limit."""
    try:
        cap = int(pltpu.get_tpu_info().vmem_capacity_bytes)
    except Exception:
        cap = 64 << 20                      # conservative: v7x per-TC VMEM
    budget = min(max(cap - (12 << 20), 16 << 20), 100 << 20)
    limit = min(cap - (2 << 20), budget + (8 << 20))
    return budget, limit


def _balanced_tile(n, max_tile, align):
    """Largest tile <= max_tile (multiple of `align`) that balances the tiles of n."""
    max_tile = max(align, (max_tile // align) * align)
    num = -(-n // max_tile)
    tile = -(-n // num)
    return _round_up(tile, align)


def _pick_tiles(n_rows, n_k, hp, budget):
    """Pick (tile_m, tile_k) so the double-buffered per-step footprint fits `budget`.

    Footprint (per TensorCore): A tile (bf16, 2 bufs) + hXW tile (f32, 2 bufs)
    + out tile (f32, 2 bufs) + f32 accumulator scratch + params.
    """
    def fp(tm, tk):
        return (2 * tm * tk * 2          # A tile, bf16, double buffered
                + 2 * tk * hp * 4        # hXW tile, f32, double buffered
                + 2 * tm * hp * 4        # out tile, f32, double buffered
                + tm * hp * 4            # accumulator scratch
                + 2 * 3 * hp * 4)        # params

    tm_max, tk_max = 1024, 2048
    tm = _balanced_tile(n_rows, tm_max, 8)
    tk = _balanced_tile(n_k, tk_max, 128)
    while fp(tm, tk) > budget and tk > 128:          # shrink K first (keeps TILE_M big)
        tk_max = max(128, tk_max // 2)
        tk = _balanced_tile(n_k, tk_max, 128)
    while fp(tm, tk) > budget and tm > 8:
        tm_max = max(8, tm_max // 2)
        tm = _balanced_tile(n_rows, tm_max, 8)
    return tm, tk


# --------------------------------------------------------------------------- kernel

def _gnn_agg_kernel(a_ref, hxw_ref, p_ref, out_ref, acc_ref, *, hidden_x):
    """One (row-tile, K-tile) step of out = LN(ReLU(A @ hXW + b_eff)) * gamma + beta.

    a_ref   : (TILE_M, TILE_K) bf16  adjacency tile (0/1, lossless in bf16)
    hxw_ref : (TILE_K, Hp)     f32   precomputed h_X @ W_X^T tile
    p_ref   : (3, Hp)          f32   [b_eff; gamma; beta], zero padded past H
    out_ref : (TILE_M, Hp)
    acc_ref : (TILE_M, Hp)     f32   accumulator scratch
    """
    k = pl.program_id(1)

    @pl.when(k == 0)
    def _init():
        acc_ref[...] = jnp.zeros_like(acc_ref)

    # bf16 A is promoted to f32 for the dot; accumulation stays f32.
    acc_ref[...] += jnp.dot(a_ref[...], hxw_ref[...],
                            preferred_element_type=jnp.float32)

    @pl.when(k == pl.num_programs(1) - 1)
    def _finish():
        z = acc_ref[...] + p_ref[0:1, :]            # Linear bias (h_t term folded in)
        z = jnp.maximum(z, 0.0)                     # ReLU
        # LayerNorm over the real hidden_X lanes.  Padded lanes of z are exactly 0
        # (hXW / b_eff zero padded), so plain sums over Hp already equal sums over H.
        inv_h = 1.0 / hidden_x
        mean = jnp.sum(z, axis=-1, keepdims=True) * inv_h
        var = jnp.sum(z * z, axis=-1, keepdims=True) * inv_h - mean * mean
        var = jnp.maximum(var, 0.0)                 # guard E[x^2]-E[x]^2 cancellation
        normed = (z - mean) * jax.lax.rsqrt(var + 1e-5)
        # gamma/beta are zero padded -> padded output lanes stay 0 (lane-dense store).
        out_ref[...] = (normed * p_ref[1:2, :] + p_ref[2:3, :]).astype(out_ref.dtype)
        # Dropout: identity in eval mode.


# --------------------------------------------------------------------------- wrapper

@partial(jax.jit, static_argnames=("has_edges",))
def gnn_layer_forward(A, h_X, h_t, W, b, gamma, beta, *, has_edges=None):
    """A: [N,N] dense float32 adjacency, h_X: [N,H], h_t: [1,Ht] (or [Ht]).
    W: [H, H+Ht] (PyTorch Linear.weight), b/gamma/beta: [H].
    has_edges: bool (A.nnz != 0) supplied by the caller (free sparse metadata);
    if None it is computed with an extra full pass over A (slower fallback)."""
    N, H = h_X.shape
    h_t = h_t.reshape(1, -1)
    Ht = h_t.shape[-1]
    assert W.shape == (H, H + Ht)

    # Reassociate (A @ h_X) @ W_X^T -> A @ (h_X @ W_X^T); fold the h_t term into bias.
    hXW = h_X @ W[:, :H].T                                # (N, H) f32
    b_eff = b + (h_t @ W[:, H:].T).reshape(-1)            # (H,)

    def no_aggregation():
        # A.nnz == 0  ->  h_aggr = h_X; trivial elementwise epilogue, no kernel needed.
        z = jnp.maximum(hXW + b_eff, 0.0)
        mean = jnp.mean(z, axis=-1, keepdims=True)
        var = jnp.mean((z - mean) ** 2, axis=-1, keepdims=True)
        return ((z - mean) * jax.lax.rsqrt(var + 1e-5) * gamma + beta).astype(h_X.dtype)

    def aggregation():
        Hp = _round_up(H, 128)
        budget, vmem_limit = _vmem_budget_bytes()
        tile_m, tile_k = _pick_tiles(N, N, Hp, budget)
        Mp, Kp = _round_up(N, tile_m), _round_up(N, tile_k)

        # Zero padding: extra A rows/cols and hXW rows are 0 -> A @ hXW unchanged.
        A_p = jnp.pad(A, ((0, Mp - N), (0, Kp - N))).astype(jnp.bfloat16)
        hXW_p = jnp.pad(hXW, ((0, Kp - N), (0, Hp - H)))
        params = jnp.pad(jnp.stack([b_eff, gamma, beta], axis=0),
                         ((0, 0), (0, Hp - H)))

        grid = (Mp // tile_m, Kp // tile_k)
        out_p = pl.pallas_call(
            partial(_gnn_agg_kernel, hidden_x=float(H)),
            out_shape=jax.ShapeDtypeStruct((Mp, Hp), h_X.dtype),
            grid_spec=pltpu.PrefetchScalarGridSpec(
                num_scalar_prefetch=0,
                grid=grid,
                in_specs=[
                    pl.BlockSpec((tile_m, tile_k), lambda i, k: (i, k)),   # A tile
                    pl.BlockSpec((tile_k, Hp), lambda i, k: (k, 0)),       # hXW tile
                    pl.BlockSpec((3, Hp), lambda i, k: (0, 0)),            # [b;gamma;beta]
                ],
                out_specs=pl.BlockSpec((tile_m, Hp), lambda i, k: (i, 0)),
                scratch_shapes=[pltpu.VMEM((tile_m, Hp), jnp.float32)],
            ),
            compiler_params=pltpu.CompilerParams(
                dimension_semantics=("parallel", "arbitrary"),
                vmem_limit_bytes=int(vmem_limit),
            ),
        )(A_p, hXW_p, params)

        if Mp != N or Hp != H:
            out_p = out_p[:N, :H]
        return out_p

    if has_edges is None:
        # Fallback: one extra full pass over A + a serialization point.
        return jax.lax.cond(jnp.any(A != 0), aggregation, no_aggregation)
    return aggregation() if has_edges else no_aggregation()


# --------------------------------------------------------------------------- reference

def _reference(A, h_X, h_t, W, b, gamma, beta):
    N, H = h_X.shape
    h_aggr = jnp.where(jnp.any(A != 0), A @ h_X, h_X)
    ht_exp = jnp.broadcast_to(h_t.reshape(1, -1), (N, h_t.size))
    cat = jnp.concatenate([h_aggr, ht_exp], axis=1)
    z = cat @ W.T + b
    z = jnp.maximum(z, 0.0)
    mean = z.mean(-1, keepdims=True)
    var = ((z - mean) ** 2).mean(-1, keepdims=True)
    return (z - mean) / jnp.sqrt(var + 1e-5) * gamma + beta


if __name__ == "__main__":
    key = jax.random.PRNGKey(0)
    N, hidden_X, hidden_t = 8, 32, 16

    k1, k2, k3, k4, k5 = jax.random.split(key, 5)
    # deterministic "sparse" adjacency as a dense float32 matrix
    A = (jax.random.uniform(k1, (N, N)) > 0.6).astype(jnp.float32)
    h_X = jax.random.normal(k2, (N, hidden_X), dtype=jnp.float32)
    h_t = jax.random.normal(k3, (1, hidden_t), dtype=jnp.float32)

    # Linear(hidden_X + hidden_t -> hidden_X) params (deterministic init)
    fan_in = hidden_X + hidden_t
    bound = 1.0 / (fan_in ** 0.5)
    W = jax.random.uniform(k4, (hidden_X, fan_in), minval=-bound, maxval=bound,
                           dtype=jnp.float32)
    b = jax.random.uniform(k5, (hidden_X,), minval=-bound, maxval=bound,
                           dtype=jnp.float32)
    gamma = jnp.ones((hidden_X,), jnp.float32)
    beta = jnp.zeros((hidden_X,), jnp.float32)

    # nnz is free metadata for a sparse adjacency; the caller passes the flag.
    has_edges = bool(jnp.any(A != 0))

    out = jax.block_until_ready(
        gnn_layer_forward(A, h_X, h_t, W, b, gamma, beta, has_edges=has_edges))
    ref = _reference(A, h_X, h_t, W, b, gamma, beta)
    assert out.shape == (N, hidden_X)
    assert jnp.allclose(out, ref, atol=1e-4, rtol=1e-4), "mismatch vs reference"

    # nnz == 0 path (aggregation skipped entirely; no kernel launch)
    A0 = jnp.zeros((N, N), jnp.float32)
    out0 = jax.block_until_ready(
        gnn_layer_forward(A0, h_X, h_t, W, b, gamma, beta, has_edges=False))
    ref0 = _reference(A0, h_X, h_t, W, b, gamma, beta)
    assert jnp.allclose(out0, ref0, atol=1e-4, rtol=1e-4), "mismatch (nnz==0 path)"

    # fallback path: flag not provided -> computed in-graph, branch via lax.cond
    out_f = jax.block_until_ready(gnn_layer_forward(A, h_X, h_t, W, b, gamma, beta))
    assert jnp.allclose(out_f, ref, atol=1e-4, rtol=1e-4), "mismatch (lax.cond fallback)"

    print("KERNEL_OK")
</pallas_src>

<mosaic_0001>
module attributes {stable_mosaic.version = 11 : i64} {
  func.func @_gnn_agg_kernel(%arg0: i32, %arg1: i32, %arg2: memref<8x128xbf16, #tpu.memory_space<vmem>>, %arg3: memref<128x128xf32, #tpu.memory_space<vmem>>, %arg4: memref<3x128xf32, #tpu.memory_space<vmem>>, %arg5: memref<8x128xf32, #tpu.memory_space<vmem>>, %arg6: memref<8x128xf32, #tpu.memory_space<vmem>>) attributes {dimension_semantics = [#tpu.dimension_semantics<parallel>, #tpu.dimension_semantics<arbitrary>], iteration_bounds = array<i64: 1, 1>, scalar_prefetch = 0 : i64, scratch_operands = 1 : i64, tpu.core_type = #tpu.core_type<tc>, window_params = [{transform_indices = @transform_0, window_bounds = array<i64: 8, 128>}, {transform_indices = @transform_1, window_bounds = array<i64: 128, 128>}, {pipeline_mode = #tpu.pipeline_mode<synchronous>, transform_indices = @transform_2, window_bounds = array<i64: 3, 128>}, {transform_indices = @transform_3, window_bounds = array<i64: 8, 128>}]} {
    %c0_i32 = arith.constant 0 : i32
    %0 = arith.cmpi eq, %arg1, %c0_i32 : i32
    %1 = arith.extui %0 : i1 to i32
    %c0_i32_0 = arith.constant 0 : i32
    %2 = arith.cmpi ne, %1, %c0_i32_0 : i32
    scf.if %2 {
      %cst_10 = arith.constant 0.000000e+00 : f32
      %12 = vector.broadcast %cst_10 : f32 to vector<8x128xf32>
      %c0_11 = arith.constant 0 : index
      %c0_12 = arith.constant 0 : index
      %13 = vector.load %arg6[%c0_11, %c0_12] : memref<8x128xf32, #tpu.memory_space<vmem>>, vector<8x128xf32>
      tpu.vector_store %arg6[%c0_11, %c0_12], %12 {strides = array<i32>} : memref<8x128xf32, #tpu.memory_space<vmem>>, vector<8x128xf32>,
    } else {
    }
    %c0 = arith.constant 0 : index
    %c0_1 = arith.constant 0 : index
    %3 = vector.load %arg6[%c0, %c0_1] : memref<8x128xf32, #tpu.memory_space<vmem>>, vector<8x128xf32>
    %c0_2 = arith.constant 0 : index
    %c0_3 = arith.constant 0 : index
    %4 = vector.load %arg2[%c0_2, %c0_3] : memref<8x128xbf16, #tpu.memory_space<vmem>>, vector<8x128xbf16>
    %c0_4 = arith.constant 0 : index
    %c0_5 = arith.constant 0 : index
    %5 = vector.load %arg3[%c0_4, %c0_5] : memref<128x128xf32, #tpu.memory_space<vmem>>, vector<128x128xf32>
    %cst = arith.constant dense<0.000000e+00> : vector<8x128xf32>
    %6 = tpu.matmul %4, %5, %cst {dimension_numbers = #tpu.dot_dimension_numbers<[1], [0], [0], [1], [0, 0, 1, 1], [], []>} : vector<8x128xbf16>, vector<128x128xf32>, vector<8x128xf32> -> vector<8x128xf32>
    %7 = arith.addf %3, %6 : vector<8x128xf32>
    %c0_6 = arith.constant 0 : index
    %c0_7 = arith.constant 0 : index
    %8 = vector.load %arg6[%c0_6, %c0_7] : memref<8x128xf32, #tpu.memory_space<vmem>>, vector<8x128xf32>
    tpu.vector_store %arg6[%c0_6, %c0_7], %7 {strides = array<i32>} : memref<8x128xf32, #tpu.memory_space<vmem>>, vector<8x128xf32>,
    %c0_i32_8 = arith.constant 0 : i32
    %9 = arith.cmpi eq, %arg1, %c0_i32_8 : i32
    %10 = arith.extui %9 : i1 to i32
    %c0_i32_9 = arith.constant 0 : i32
    %11 = arith.cmpi ne, %10, %c0_i32_9 : i32
    scf.if %11 {
      %c0_10 = arith.constant 0 : index
      %c0_11 = arith.constant 0 : index
      %12 = vector.load %arg6[%c0_10, %c0_11] : memref<8x128xf32, #tpu.memory_space<vmem>>, vector<8x128xf32>
      %c0_12 = arith.constant 0 : index
      %c0_13 = arith.constant 0 : index
      %13 = vector.load %arg4[%c0_12, %c0_13] : memref<3x128xf32, #tpu.memory_space<vmem>>, vector<1x128xf32>
      %14 = vector.broadcast %13 : vector<1x128xf32> to vector<8x128xf32>
      %15 = arith.addf %12, %14 : vector<8x128xf32>
      %cst_14 = arith.constant 0.000000e+00 : f32
      %16 = vector.broadcast %cst_14 : f32 to vector<8x128xf32>
      %17 = arith.maximumf %15, %16 : vector<8x128xf32>
      %cst_15 = arith.constant dense<0.000000e+00> : vector<8xf32>
      %18 = vector.multi_reduction <add>, %17, %cst_15 [1] : vector<8x128xf32> to vector<8xf32>
      %19 = vector.shape_cast %18 : vector<8xf32> to vector<8x1xf32>
      %cst_16 = arith.constant 3.125000e-02 : f32
      %20 = vector.broadcast %cst_16 : f32 to vector<8x1xf32>
      %21 = arith.mulf %19, %20 : vector<8x1xf32>
      %22 = arith.mulf %17, %17 : vector<8x128xf32>
      %cst_17 = arith.constant dense<0.000000e+00> : vector<8xf32>
      %23 = vector.multi_reduction <add>, %22, %cst_17 [1] : vector<8x128xf32> to vector<8xf32>
      %24 = vector.shape_cast %23 : vector<8xf32> to vector<8x1xf32>
      %cst_18 = arith.constant 3.125000e-02 : f32
      %25 = vector.broadcast %cst_18 : f32 to vector<8x1xf32>
      %26 = arith.mulf %24, %25 : vector<8x1xf32>
      %27 = arith.mulf %21, %21 : vector<8x1xf32>
      %28 = arith.subf %26, %27 : vector<8x1xf32>
      %cst_19 = arith.constant 0.000000e+00 : f32
      %29 = vector.broadcast %cst_19 : f32 to vector<8x1xf32>
      %30 = arith.maximumf %28, %29 : vector<8x1xf32>
      %31 = vector.broadcast %21 : vector<8x1xf32> to vector<8x128xf32>
      %32 = arith.subf %17, %31 : vector<8x128xf32>
      %cst_20 = arith.constant 9.99999974E-6 : f32
      %33 = vector.broadcast %cst_20 : f32 to vector<8x1xf32>
      %34 = arith.addf %30, %33 : vector<8x1xf32>
      %35 = math.rsqrt %34 : vector<8x1xf32>
      %36 = vector.broadcast %35 : vector<8x1xf32> to vector<8x128xf32>
      %37 = arith.mulf %32, %36 : vector<8x128xf32>
      %c1 = arith.constant 1 : index
      %c0_21 = arith.constant 0 : index
      %38 = vector.load %arg4[%c1, %c0_21] : memref<3x128xf32, #tpu.memory_space<vmem>>, vector<1x128xf32>
      %39 = vector.broadcast %38 : vector<1x128xf32> to vector<8x128xf32>
      %40 = arith.mulf %37, %39 : vector<8x128xf32>
      %c2 = arith.constant 2 : index
      %c0_22 = arith.constant 0 : index
      %41 = vector.load %arg4[%c2, %c0_22] : memref<3x128xf32, #tpu.memory_space<vmem>>, vector<1x128xf32>
      %42 = vector.broadcast %41 : vector<1x128xf32> to vector<8x128xf32>
      %43 = arith.addf %40, %42 : vector<8x128xf32>
      %c0_23 = arith.constant 0 : index
      %c0_24 = arith.constant 0 : index
      %44 = vector.load %arg5[%c0_23, %c0_24] : memref<8x128xf32, #tpu.memory_space<vmem>>, vector<8x128xf32>
      tpu.vector_store %arg5[%c0_23, %c0_24], %43 {strides = array<i32>} : memref<8x128xf32, #tpu.memory_space<vmem>>, vector<8x128xf32>,
    } else {
    }
    return
  }
  func.func @transform_0(%arg0: i32, %arg1: i32) -> (i32, i32) {
    %c0_i32 = arith.constant 0 : i32
    return %arg0, %arg1 : i32, i32
  }
  func.func @transform_1(%arg0: i32, %arg1: i32) -> (i32, i32) {
    %c0_i32 = arith.constant 0 : i32
    %c0_i32_0 = arith.constant 0 : i32
    return %arg1, %c0_i32 : i32, i32
  }
  func.func @transform_2(%arg0: i32, %arg1: i32) -> (i32, i32) {
    %c0_i32 = arith.constant 0 : i32
    %c0_i32_0 = arith.constant 0 : i32
    %c0_i32_1 = arith.constant 0 : i32
    return %c0_i32, %c0_i32_0 : i32, i32
  }
  func.func @transform_3(%arg0: i32, %arg1: i32) -> (i32, i32) {
    %c0_i32 = arith.constant 0 : i32
    %c0_i32_0 = arith.constant 0 : i32
    return %arg0, %c0_i32 : i32, i32
  }
}

</mosaic_0001>

<bundles_post_ra>
// kernel: gnn_layer_forward.1
= control target key start
LH: loop header
LB: loop body
LE: loop exit
PB: predicated region body
PF: predicated region fallthrough
CT: control target
= control target key end

     0   :  { %v275_v3 = vmov 0.0|0.0   ;;  %vm276_vm0 = vmmov 0   ;;  %v277_v6 = vmov 0.0   ;;  %s371_s0 = inlined_call_operand.vmem [shape: bf16[8,128], index: 0, kind: input, shape index: {}]   ;;  %s372_s1 = inlined_call_operand.vmem [shape: f32[128,128], index: 1, kind: input, shape index: {}]   ;;  %s373_s2 = inlined_call_operand.vmem [shape: f32[3,128], index: 2, kind: input, shape index: {}]   ;;  %s374_s3 = inlined_call_operand.hbm [shape: f32[8,128], index: 3, kind: output, shape index: {}]  }
   0x1   :  { %v23_v0 = vld [vmem:[%s372_s1] sm:$0xff]  ;;  %v24_v1 = vld [vmem:[%s372_s1 + $0x8] sm:$0xff]  ;;  %v25_v2 = vld [vmem:[%s372_s1 + $0x10] sm:$0xff]  ;;  %221 = vmatprep.subr.bf16.mxu0 %v275_v3  ;;  %217 = vmatprep.mubr.msk.bf16.mxu0 %vm276_vm0, %v277_v6 }
   0x2   :  { %v222_v4 = vpack.c.bf16 %v24_v1, %v23_v0  ;;  %v26_v5 = vld [vmem:[%s372_s1 + $0x18] sm:$0xff]  ;;  %v27_v8 = vld [vmem:[%s372_s1 + $0x20] sm:$0xff]  ;;  %v28_v9 = vld [vmem:[%s372_s1 + $0x28] sm:$0xff] }
   0x3   :  { %v225_v7 = vpack.c.bf16 %v26_v5, %v25_v2 }
   0x4   :  { %223 = vmatpush3.bf16.msra.mxu0 %v222_v4 }
   0x5   :  { %224 = vmatprep.subr.bf16.mxu0 %v275_v3 }
   0x6   :  { %8 = vsyncpa [#allocation4], 0  ;;  %v228_v10 = vpack.c.bf16 %v28_v9, %v27_v8  ;;  %v29_v11 = vld [vmem:[%s372_s1 + $0x30] sm:$0xff]  ;;  %v30_v12 = vld [vmem:[%s372_s1 + $0x38] sm:$0xff]  ;;  %s278_s23 = smov [#allocation3]  }
   0x7   :  { %v231_v13 = vpack.c.bf16 %v30_v12, %v29_v11  ;;  %v31_v14 = vld [vmem:[%s372_s1 + $0x40] sm:$0xff]  ;;  %v32_v15 = vld [vmem:[%s372_s1 + $0x48] sm:$0xff]  ;;  %v33_v17 = vld [vmem:[%s372_s1 + $0x50] sm:$0xff]  ;;  %s157_s24 = sshll.u32 %s278_s23, 4  ;;  %s158_s24 = int_to_ptr.vmem [resolvable:$true] %s157_s24 }
   0x8   :  { %226 = vmatpush3.bf16.msra.mxu0 %v225_v7  ;;  %v234_v16 = vpack.c.bf16 %v32_v15, %v31_v14  ;;  %v34_v18 = vld [vmem:[%s372_s1 + $0x58] sm:$0xff]  ;;  %v35_v20 = vld [vmem:[%s372_s1 + $0x60] sm:$0xff]  ;;  %v36_v21 = vld [vmem:[%s372_s1 + $0x68] sm:$0xff]  ;;  %s251_s25 = scalar_lea.vmem %s158_s24, 128  ;;  %p256_p1 = scmp.lt.s32.totalorder %s158_s24, %s158_s24 }
   0x9   :  { %227 = vmatprep.subr.bf16.mxu0 %v275_v3  ;;  %v237_v19 = vpack.c.bf16 %v34_v18, %v33_v17  ;;  %v240_v22 = vpack.c.bf16 %v36_v21, %v35_v20  ;;  %v37_v23 = vld [vmem:[%s372_s1 + $0x70] sm:$0xff]  ;;  %v38_v24 = vld [vmem:[%s372_s1 + $0x78] sm:$0xff]  ;;  %v22_v26 = vld [vmem:[%s371_s0] sm:$0xf]  ;;  %p252_p0 = scmp.ne.s32.totalorder %s158_s24, %s251_s25  ;;  %p257_p2 = scmp.lt.s32.totalorder %s251_s25, %s251_s25 }
   0xa   :  { %v243_v25 = vpack.c.bf16 %v38_v24, %v37_v23  ;;  %v165_v27 = vld [vmem:[%s373_s2] ss:$0 sm:$0xff]  ;;  %v166_v45 = vld [vmem:[%s373_s2 + $0x1] ss:$0 sm:$0xff]  ;;  %v167_v47 = vld [vmem:[%s373_s2 + $0x2] ss:$0 sm:$0xff] }
   0xb   :  { %p258_p3 = por %p257_p2, %p256_p1 }
   0xc   :  { %229 = vmatpush3.bf16.msra.mxu0 %v228_v10 }
   0xd   :  { %230 = vmatprep.subr.bf16.mxu0 %v275_v3  ;;  %p259_p4 = pnand %p258_p3, %p252_p0 }
  0x10   :  { %232 = vmatpush3.bf16.msra.mxu0 %v231_v13 }
  0x11   :  { %233 = vmatprep.subr.bf16.mxu0 %v275_v3 }
  0x14   :  { %235 = vmatpush3.bf16.msra.mxu0 %v234_v16 }
  0x15   :  { %236 = vmatprep.subr.bf16.mxu0 %v275_v3 }
  0x18   :  { %238 = vmatpush3.bf16.msra.mxu0 %v237_v19 }
  0x19   :  { %239 = vmatprep.subr.bf16.mxu0 %v275_v3 }
  0x1c   :  { %241 = vmatpush3.bf16.msra.mxu0 %v240_v22 }
  0x1d   :  { %242 = vmatprep.subr.bf16.mxu0 %v275_v3 }
  0x20   :  { %244 = vmatpush3.bf16.msra.mxu0 %v243_v25 }
  0x23   :  { %218 = vmatmul.mubr.bf16.vlgmr.msra.gmra.mrb[0].mxu0 %v22_v26 }
  0xf6   :  { %v105_v28 = vpop.f32.mrb[0].mxu0 }
  0xf7   :  { %v122_v29 = vadd.f32 %v165_v27, %v105_v28  ;;  %v219_v30 = vpop.f32.mrb[1].mxu0 }
  0xf8   :  { %v108_v31 = vpop.f32.mrb[2].mxu0 }
  0xf9   :  { %v123_v32 = vmax.f32 %v122_v29, 0.0  ;;  %v220_v33 = vpop.f32.mrb[3].mxu0 }
  0xfb   :  { %124 = vadd.xlane.f32.xlu0 %v123_v32  ;;  %v127_v34 = vmul.f32 %v123_v32, %v123_v32 }
  0xff   :  { %128 = vadd.xlane.f32.xlu0 %v127_v34 }
 0x188   :  { %v125_v35 = vpop.xlane.xlu0 %124 }
 0x189   :  { %v126_v36 = vmul.f32 0.03125, %v125_v35 }
 0x18b   :  { %v131_v38 = vmul.f32 %v126_v36, %v126_v36  ;;  %v134_v43 = vsub.f32 %v123_v32, %v126_v36 }
 0x18c   :  { %v129_v37 = vpop.xlane.xlu0 %128 }
 0x18d   :  { %v130_v39 = vmul.f32 0.03125, %v129_v37 }
 0x18f   :  { %v132_v40 = vsub.f32 %v130_v39, %v131_v38 }
 0x191   :  { %v133_v41 = vmax.f32 %v132_v40, 0.0 }
 0x193   :  { %v135_v42 = vadd.f32 1e-05, %v133_v41 }
 0x195   :  { %249 = vrsqrt.f32 %v135_v42 }
 0x19f   :  { %v250_v44 = vpop.eup %249 }
 0x1a0   :  { %v137_v46 = vmul.f32 %v250_v44, %v134_v43 }
 0x1a2   :  { %v143_v48 = vmul.f32 %v166_v45, %v137_v46 }
 0x1a4   :  { %v149_v49 = vadd.f32 %v167_v47, %v143_v48 }
 0x1a6   :  { %150 = vst [vmem:[#allocation3] sm:$0xff] %v149_v49 }
 0x1a7   :  { %262 = shalt.err (!%p259_p4)
}
 0x1a8   :  { %s263_s28 = scalar_lea.hbm %s374_s3, 128 }
 0x1a9   :  { %p264_p5 = scmp.ne.s32.totalorder %s374_s3, %s263_s28  ;;  %p267_p6 = scmp.lt.u32.totalorder %s263_s28, %s374_s3 }
 0x1ab   :  { %p269_p7 = pnand %p267_p6, %p264_p5 }
 0x1ad   :  { %272 = shalt.err (!%p269_p7)
}
 0x1ae   :  { %160 = dma.vmem_to_hbm [thread:$0]  %s158_s24, 128, %s374_s3, [#allocation4]  }
 0x1af   :  { %273 = dma.done.wait [#allocation4], 128  }
 0x1b0   :  { %274 = vsyncadd [#allocation4], 4294967168 }
 0x1b1   :  { %164 = vsyncpa [#allocation4], 1 }

</bundles_post_ra>
